<compile_context>
chip_gen: v7x
topology: tpu7x:2x2x1
jax: 0.10.0
libtpu: 0.0.40
codegen_flags: <defaults>
</compile_context>

<pallas_src>
import jax
import jax.numpy as jnp
from jax.experimental import pallas as pl
from jax.experimental.pallas import tpu as pltpu


def deep_bourgain_kernel(adj_ref, xa_ref, b_ref, out_ref):
    """One row tile: out = l2_normalize((adj @ [X|1]) * (1/rowsum) + b)."""
    out_dim = out_ref.shape[-1]

    # (tm, n) @ (n, out_dim + 1) -> (tm, out_dim + 1); last column is the row sum.
    # adj may be bf16 in HBM; the dot promotes to f32 and accumulates in f32.
    agg_aug = jnp.dot(adj_ref[...], xa_ref[...],
                      preferred_element_type=jnp.float32)
    agg = agg_aug[:, :out_dim]          # (tm, out_dim)  == (adj @ X) tile
    row_sum = agg_aug[:, out_dim:]      # (tm, 1)        == adj row sums

    # diag(1/rowsum) @ A @ X == (A @ X) * (1/rowsum); then the Linear bias.
    pred = agg * pl.reciprocal(row_sum, approx=False) + b_ref[...]

    # F.normalize(p=2, dim=-1, eps=1e-12).
    sumsq = jnp.sum(pred * pred, axis=-1, keepdims=True)
    out_ref[...] = pred * jax.lax.rsqrt(jnp.maximum(sumsq, 1e-24))


def _pick_row_tile(n, adj_itemsize, budget_bytes=16 << 20):
    """Largest row tile (multiple of 8) whose double-buffered adj slab fits budget."""
    if n <= 1024:
        return n
    tm = budget_bytes // (2 * n * adj_itemsize)
    tm = max(8, min(1024, (tm // 8) * 8))
    return min(tm, n)


def deep_bourgain_forward(node_feature, adj_count, w_out2, b_out2, *, row_tile=None):
    """node_feature: (n, 1, d); adj_count: (n, n) f32 or bf16; w_out2: (out, d); b_out2: (out,)."""
    n, _, d = node_feature.shape
    out_dim = w_out2.shape[0]

    # --- XLA glue on tiny tensors --------------------------------------------
    # Reassociated projection X = nf @ W^T, augmented with a ones column so the
    # kernel's single MXU pass also produces the adjacency row sums.
    nf2d = node_feature.reshape(n, d).astype(jnp.float32)
    x = nf2d @ jnp.transpose(w_out2).astype(jnp.float32)                  # (n, out)
    x_aug = jnp.concatenate([x, jnp.ones((n, 1), jnp.float32)], axis=-1)  # (n, out+1)
    b2d = b_out2.reshape(1, out_dim).astype(jnp.float32)

    # --- tiling ---------------------------------------------------------------
    adj_itemsize = jnp.dtype(adj_count.dtype).itemsize
    tm = _pick_row_tile(n, adj_itemsize) if row_tile is None else row_tile
    num_tiles = pl.cdiv(n, tm)

    # VMEM budget: double-buffered adj tile + resident [X|1]/bias + output tiles.
    vmem_need = (2 * tm * n * adj_itemsize + x_aug.size * 4
                 + 2 * tm * out_dim * 4 + (1 << 14))
    vmem_limit = None
    if vmem_need > (8 << 20):
        # v5e's default scoped VMEM is only 16 MiB; v7x has 64 MiB physical.
        vmem_limit = min(vmem_need + (8 << 20), 64 << 20)

    grid_spec = pltpu.PrefetchScalarGridSpec(
        num_scalar_prefetch=0,
        grid=(num_tiles,),
        in_specs=[
            pl.BlockSpec((tm, n), lambda i: (i, 0)),             # adj row tile (streamed)
            pl.BlockSpec((n, out_dim + 1), lambda i: (0, 0)),    # [X | 1], resident
            pl.BlockSpec((1, out_dim), lambda i: (0, 0)),        # bias, resident
        ],
        out_specs=pl.BlockSpec((tm, out_dim), lambda i: (i, 0)),
    )

    return pl.pallas_call(
        deep_bourgain_kernel,
        out_shape=jax.ShapeDtypeStruct((n, out_dim), jnp.float32),
        grid_spec=grid_spec,
        compiler_params=pltpu.CompilerParams(
            dimension_semantics=("parallel",),   # rows independent -> megacore on v7x
            vmem_limit_bytes=vmem_limit,
        ),
    )(adj_count, x_aug, b2d)


def xavier_uniform_relu(key, shape):
    """torch.nn.init.xavier_uniform_ with gain=calculate_gain('relu')=sqrt(2)."""
    fan_out, fan_in = shape  # torch Linear weight is (out_features, in_features)
    bound = jnp.sqrt(2.0) * jnp.sqrt(6.0 / (fan_in + fan_out))
    return jax.random.uniform(key, shape, jnp.float32, -bound, bound)


def reference_forward(node_feature, adj_count, w_out2, b_out2):
    """Pure-JAX mirror of DeepBourgain.forward (PyTorch op order)."""
    nf = node_feature[:, 0, :].astype(jnp.float32)
    adj = adj_count.astype(jnp.float32)
    adj = adj / jnp.sum(adj, axis=-1, keepdims=True)
    pred = adj @ nf
    pred = pred @ w_out2.T + b_out2
    norm = jnp.sqrt(jnp.sum(pred * pred, axis=-1, keepdims=True))
    return pred / jnp.maximum(norm, 1e-12)


def _check(name, out, ref, atol=3e-5, rtol=3e-5):
    assert out.shape == ref.shape, (name, out.shape, ref.shape)
    err = float(jnp.max(jnp.abs(out - ref)))
    assert jnp.allclose(out, ref, atol=atol, rtol=rtol), f"{name}: max abs err {err}"


if __name__ == "__main__":
    key = jax.random.PRNGKey(0)
    d, out_dim = 32, 16
    k_nf, k_adj, k_w, k_b = jax.random.split(key, 4)

    # out_2 = nn.Linear(input_dim, output_dim): xavier_uniform (relu gain), zero bias.
    w_out2 = xavier_uniform_relu(k_w, (out_dim, d))
    b_out2 = jnp.zeros((out_dim,), jnp.float32)
    # NOTE: feature_*/attention/deepset_*/agg_*/dist_*/out_1/dist_compute/
    # feature_compute parameters exist in __init__ but are unused by forward().

    # ---- test 1: tiny graph, single tile (faithful module init: zero bias) ----
    n1 = 8
    nf1 = jax.random.normal(k_nf, (n1, 1, d), jnp.float32)
    adj1 = jax.random.uniform(k_adj, (n1, n1), jnp.float32, 0.1, 1.0)  # nonzero row sums
    out1 = jax.block_until_ready(deep_bourgain_forward(nf1, adj1, w_out2, b_out2))
    _check("tiny", out1, reference_forward(nf1, adj1, w_out2, b_out2))

    # ---- test 2: row-tiled grid (4 parallel tiles), non-zero ("trained") bias ----
    n2 = 256
    nf2 = jax.random.normal(k_nf, (n2, 1, d), jnp.float32)
    adj2 = jax.random.uniform(k_adj, (n2, n2), jnp.float32, 0.1, 1.0)
    b_trained = 0.1 * jax.random.normal(k_b, (out_dim,), jnp.float32)
    out2 = jax.block_until_ready(
        deep_bourgain_forward(nf2, adj2, w_out2, b_trained, row_tile=64))
    _check("tiled", out2, reference_forward(nf2, adj2, w_out2, b_trained))

    # ---- test 3: bf16 adjacency in HBM (half the DMA bytes), f32 accumulation ----
    adj2_bf16 = adj2.astype(jnp.bfloat16)
    out3 = jax.block_until_ready(
        deep_bourgain_forward(nf2, adj2_bf16, w_out2, b_trained, row_tile=64))
    _check("bf16_adj", out3, reference_forward(nf2, adj2_bf16, w_out2, b_trained))

    print("KERNEL_OK")
</pallas_src>

<mosaic_0001>
module attributes {stable_mosaic.version = 11 : i64} {
  func.func @deep_bourgain_kernel(%arg0: i32, %arg1: memref<8x8xf32, #tpu.memory_space<vmem>>, %arg2: memref<8x17xf32, #tpu.memory_space<vmem>>, %arg3: memref<1x16xf32, #tpu.memory_space<vmem>>, %arg4: memref<8x16xf32, #tpu.memory_space<vmem>>) attributes {dimension_semantics = [#tpu.dimension_semantics<parallel>], iteration_bounds = array<i64: 1>, scalar_prefetch = 0 : i64, scratch_operands = 0 : i64, tpu.core_type = #tpu.core_type<tc>, window_params = [{transform_indices = @transform_0, window_bounds = array<i64: 8, 8>}, {pipeline_mode = #tpu.pipeline_mode<synchronous>, transform_indices = @transform_1, window_bounds = array<i64: 8, 17>}, {pipeline_mode = #tpu.pipeline_mode<synchronous>, transform_indices = @transform_2, window_bounds = array<i64: 1, 16>}, {transform_indices = @transform_3, window_bounds = array<i64: 8, 16>}]} {
    %c0 = arith.constant 0 : index
    %c0_0 = arith.constant 0 : index
    %0 = vector.load %arg1[%c0, %c0_0] : memref<8x8xf32, #tpu.memory_space<vmem>>, vector<8x8xf32>
    %c0_1 = arith.constant 0 : index
    %c0_2 = arith.constant 0 : index
    %1 = vector.load %arg2[%c0_1, %c0_2] : memref<8x17xf32, #tpu.memory_space<vmem>>, vector<8x17xf32>
    %cst = arith.constant dense<0.000000e+00> : vector<8x17xf32>
    %2 = tpu.matmul %0, %1, %cst {dimension_numbers = #tpu.dot_dimension_numbers<[1], [0], [0], [1], [0, 0, 1, 1], [], []>} : vector<8x8xf32>, vector<8x17xf32>, vector<8x17xf32> -> vector<8x17xf32>
    %3 = vector.extract_strided_slice %2 {offsets = [0, 0], sizes = [8, 16], strides = [1, 1]} : vector<8x17xf32> to vector<8x16xf32>
    %4 = vector.extract_strided_slice %2 {offsets = [0, 16], sizes = [8, 1], strides = [1, 1]} : vector<8x17xf32> to vector<8x1xf32>
    %5 = tpu.reciprocal %4 : vector<8x1xf32> -> vector<8x1xf32>
    %6 = vector.broadcast %5 : vector<8x1xf32> to vector<8x16xf32>
    %7 = arith.mulf %3, %6 : vector<8x16xf32>
    %c0_3 = arith.constant 0 : index
    %c0_4 = arith.constant 0 : index
    %8 = vector.load %arg3[%c0_3, %c0_4] : memref<1x16xf32, #tpu.memory_space<vmem>>, vector<1x16xf32>
    %9 = vector.broadcast %8 : vector<1x16xf32> to vector<8x16xf32>
    %10 = arith.addf %7, %9 : vector<8x16xf32>
    %11 = arith.mulf %10, %10 : vector<8x16xf32>
    %cst_5 = arith.constant dense<0.000000e+00> : vector<8xf32>
    %12 = vector.multi_reduction <add>, %11, %cst_5 [1] : vector<8x16xf32> to vector<8xf32>
    %13 = vector.shape_cast %12 : vector<8xf32> to vector<8x1xf32>
    %cst_6 = arith.constant 1.000000e-24 : f32
    %14 = vector.broadcast %cst_6 : f32 to vector<8x1xf32>
    %15 = arith.maximumf %13, %14 : vector<8x1xf32>
    %16 = math.rsqrt %15 : vector<8x1xf32>
    %17 = vector.broadcast %16 : vector<8x1xf32> to vector<8x16xf32>
    %18 = arith.mulf %10, %17 : vector<8x16xf32>
    %c0_7 = arith.constant 0 : index
    %c0_8 = arith.constant 0 : index
    %19 = vector.load %arg4[%c0_7, %c0_8] : memref<8x16xf32, #tpu.memory_space<vmem>>, vector<8x16xf32>
    tpu.vector_store %arg4[%c0_7, %c0_8], %18 {strides = array<i32>} : memref<8x16xf32, #tpu.memory_space<vmem>>, vector<8x16xf32>,
    return
  }
  func.func @transform_0(%arg0: i32) -> (i32, i32) {
    %c0_i32 = arith.constant 0 : i32
    %c0_i32_0 = arith.constant 0 : i32
    return %arg0, %c0_i32 : i32, i32
  }
  func.func @transform_1(%arg0: i32) -> (i32, i32) {
    %c0_i32 = arith.constant 0 : i32
    %c0_i32_0 = arith.constant 0 : i32
    %c0_i32_1 = arith.constant 0 : i32
    return %c0_i32, %c0_i32_0 : i32, i32
  }
  func.func @transform_2(%arg0: i32) -> (i32, i32) {
    %c0_i32 = arith.constant 0 : i32
    %c0_i32_0 = arith.constant 0 : i32
    %c0_i32_1 = arith.constant 0 : i32
    return %c0_i32, %c0_i32_0 : i32, i32
  }
  func.func @transform_3(%arg0: i32) -> (i32, i32) {
    %c0_i32 = arith.constant 0 : i32
    %c0_i32_0 = arith.constant 0 : i32
    return %arg0, %c0_i32 : i32, i32
  }
}

</mosaic_0001>

<bundles_post_ra>
// kernel: tpu_custom_call.1
= control target key start
LH: loop header
LB: loop body
LE: loop exit
PB: predicated region body
PF: predicated region fallthrough
CT: control target
= control target key end

     0   :  { %8 = vsyncpa [#allocation3], 0  ;;  %s312_s0 = inlined_call_operand.hbm [shape: f32[8,8], index: 0, kind: input, shape index: {}]   ;;  %s313_s1 = inlined_call_operand.hbm [shape: f32[8,17], index: 1, kind: input, shape index: {}]   ;;  %s314_s2 = inlined_call_operand.vmem [shape: f32[1,16], index: 2, kind: input, shape index: {}]   ;;  %s315_s3 = inlined_call_operand.hbm [shape: f32[8,16], index: 3, kind: output, shape index: {}]  }
   0x1   :  { %9 = vsyncpa [#allocation6], 0 }
   0x2   :  { %10 = vsyncpa [#allocation4], 0  ;;  %s247_s12 = smov [#allocation2]   ;;  %s248_s14 = smov [#allocation5]  }
   0x3   :  { %s17_s13 = sshll.u32 %s247_s12, 4  ;;  %s27_s15 = sshll.u32 %s248_s14, 4  ;;  %s18_s13 = int_to_ptr.vmem [resolvable:$true] %s17_s13  ;;  %s28_s15 = int_to_ptr.vmem [resolvable:$true] %s27_s15 }
   0x4   :  { %s175_s18 = scalar_lea.hbm %s312_s0, 128 }
   0x5   :  { %p176_p0 = scmp.ne.s32.totalorder %s312_s0, %s175_s18  ;;  %p179_p1 = scmp.lt.u32.totalorder %s175_s18, %s312_s0 }
   0x7   :  { %p181_p2 = pnand %p179_p1, %p176_p0 }
   0x9   :  { %184 = shalt.err (!%p181_p2)
}
   0xa   :  { %s185_s23 = scalar_lea.vmem %s18_s13, 128  ;;  %p190_p4 = scmp.lt.s32.totalorder %s18_s13, %s18_s13 }
   0xb   :  { %p186_p3 = scmp.ne.s32.totalorder %s18_s13, %s185_s23  ;;  %p191_p5 = scmp.lt.s32.totalorder %s185_s23, %s185_s23 }
   0xd   :  { %p192_p6 = por %p191_p5, %p190_p4 }
   0xf   :  { %p193_p7 = pnand %p192_p6, %p186_p3 }
  0x11   :  { %196 = shalt.err (!%p193_p7)
}
  0x12   :  { %20 = dma.hbm_to_vmem [thread:$0]  %s312_s0, 128, %s18_s13, [#allocation3]  }
  0x13   :  { %s197_s28 = scalar_lea.hbm %s313_s1, 128 }
  0x14   :  { %p198_p8 = scmp.ne.s32.totalorder %s313_s1, %s197_s28  ;;  %p201_p9 = scmp.lt.u32.totalorder %s197_s28, %s313_s1 }
  0x16   :  { %p203_p10 = pnand %p201_p9, %p198_p8 }
  0x18   :  { %206 = shalt.err (!%p203_p10)
}
  0x19   :  { %s207_s6 = scalar_lea.vmem %s28_s15, 128  ;;  %p212_p12 = scmp.lt.s32.totalorder %s28_s15, %s28_s15 }
  0x1a   :  { %p208_p11 = scmp.ne.s32.totalorder %s28_s15, %s207_s6  ;;  %p213_p13 = scmp.lt.s32.totalorder %s207_s6, %s207_s6 }
  0x1c   :  { %p214_p0 = por %p213_p13, %p212_p12 }
  0x1e   :  { %p215_p1 = pnand %p214_p0, %p208_p11 }
  0x20   :  { %218 = shalt.err (!%p215_p1)
}
  0x21   :  { %30 = dma.hbm_to_vmem [thread:$0]  %s313_s1, 128, %s28_s15, [#allocation6]  }
  0x22   :  { %241 = dma.done.wait [#allocation3], 128  }
  0x23   :  { %242 = vsyncadd [#allocation3], 4294967168 }
  0x24   :  { %243 = dma.done.wait [#allocation6], 128  }
  0x25   :  { %244 = vsyncadd [#allocation6], 4294967168  ;;  %v249_v0 = vmov 0.0   ;;  %vm250_vm0 = vmmov 0   ;;  %vm41_vm1 = vcmask 64512   ;;  %v40_v1 = vld [vmem:[#allocation5] sm:$0xff] }
  0x26   :  { %159 = vmatprep.subr.mxu0 %v249_v0  ;;  %161 = vmatprep.mubr.msk.f32.mxu0 %vm250_vm0, %v249_v0  ;;  %v39_v2 = vld [vmem:[#allocation2] sm:$0xff]  ;;  %v251_v3 = vmov 16   ;;  %vm131_vm2 = vcmask 130048   ;;  %s252_s9 = smov [#allocation7]  }
  0x27   :  { %160 = vmatpush3.msra.mxu0 %v40_v1  ;;  %170 = vset.pattern.permute.xlu0 %v251_v3  ;;  %v156_v7 = vld [vmem:[%s314_s2] ss:$0 sm:$0xff]  ;;  %s145_s10 = sshll.u32 %s252_s9, 4  ;;  %s146_s10 = int_to_ptr.vmem [resolvable:$true] %s145_s10 }
  0x28   :  { %162 = vmatmul.mubr.msk.f32.vlgmr.msra.gmra.mrb[0].mxu0 %vm41_vm1, %v39_v2  ;;  %s219_s11 = scalar_lea.vmem %s146_s10, 128  ;;  %p224_p3 = scmp.lt.s32.totalorder %s146_s10, %s146_s10 }
  0x29   :  { %p220_p2 = scmp.ne.s32.totalorder %s146_s10, %s219_s11  ;;  %p225_p4 = scmp.lt.s32.totalorder %s219_s11, %s219_s11 }
  0x2b   :  { %p226_p5 = por %p225_p4, %p224_p3 }
  0x2d   :  { %p227_p6 = pnand %p226_p5, %p220_p2 }
  0xfb   :  { %v111_v4 = vpop.f32.mrb[0].mxu0 }
  0xfc   :  { %171 = vrcp.f32 %v111_v4  ;;  %v163_v5 = vpop.f32.mrb[1].mxu0 }
 0x106   :  { %v172_v6 = vpop.eup %171 }
 0x107   :  { %118 = vperm.xlu0 %170, %v172_v6  }
 0x186   :  { %v119_v8 = vpop.permute.xlu0 %118 }
 0x187   :  { %v121_v9 = vmul.f32 %v119_v8, %v111_v4 }
 0x189   :  { %v129_v10 = vadd.f32 %v156_v7, %v121_v9 }
 0x18b   :  { %v130_v11 = vmul.f32 %v129_v10, %v129_v10 }
 0x18d   :  { %v132_v12 = vsel %vm131_vm2, %v130_v11, 0.0 }
 0x18e   :  { %133 = vadd.xlane.f32.xlu0 %v132_v12 }
 0x21b   :  { %v134_v13 = vpop.xlane.xlu0 %133 }
 0x21c   :  { %v135_v14 = vmax.f32 %v134_v13, 1e-24 }
 0x21e   :  { %173 = vrsqrt.f32 %v135_v14 }
 0x228   :  { %v174_v15 = vpop.eup %173 }
 0x229   :  { %v137_v16 = vmul.f32 %v174_v15, %v129_v10 }
 0x22b   :  { %138 = vst.msk [vmem:[#allocation7] sm:$0xff] %vm131_vm2, %v137_v16 }
 0x22c   :  { %230 = shalt.err (!%p227_p6)
}
 0x22d   :  { %s231_s13 = scalar_lea.hbm %s315_s3, 128 }
 0x22e   :  { %p232_p7 = scmp.ne.s32.totalorder %s315_s3, %s231_s13  ;;  %p235_p8 = scmp.lt.u32.totalorder %s231_s13, %s315_s3 }
 0x230   :  { %p237_p9 = pnand %p235_p8, %p232_p7 }
 0x232   :  { %240 = shalt.err (!%p237_p9)
}
 0x233   :  { %148 = dma.vmem_to_hbm [thread:$0]  %s146_s10, 128, %s315_s3, [#allocation4]  }
 0x234   :  { %245 = dma.done.wait [#allocation4], 128  }
 0x235   :  { %246 = vsyncadd [#allocation4], 4294967168 }
 0x236   :  { %152 = vsyncpa [#allocation3], 1 }
 0x237   :  { %153 = vsyncpa [#allocation6], 1 }
 0x238   :  { %154 = vsyncpa [#allocation4], 1 }

</bundles_post_ra>
